<compile_context>
chip_gen: v6e
topology: v6e:2x2x1
jax: 0.10.0
libtpu: 0.0.40
codegen_flags: <defaults>
</compile_context>

<pallas_src>
import functools
import numpy as np
import jax
import jax.numpy as jnp
from jax.experimental import pallas as pl
from jax.experimental.pallas import tpu as pltpu


def _round_up(n, m):
    return (n + m - 1) // m * m


# ---------------------------------------------------------------------------
# Pallas kernels
# ---------------------------------------------------------------------------
def _opn_mat_kernel(x_ref, k_ref, o_ref, *, num_fields, embed_dim, mm_dtype):
    """kernel_type == 'mat'.

    x_ref: (F, D, TB)      batch on lanes; pair gather = static leading-dim slices
    k_ref: (num_ix*D, D)   rows [n*D + d1] hold K[d1, n, :], grouped per row field
    o_ref: (num_ix, TB)    lane-dense output
    """
    F, D = num_fields, embed_dim
    off = 0
    for i in range(F - 1):                                   # static, unrolled
        nj = F - 1 - i                                       # pairs with row == i
        p_i = x_ref[i].astype(mm_dtype)                      # (D, TB)
        k_i = k_ref[pl.ds(off * D, nj * D), :]               # (nj*D, D) contiguous
        # One grouped MXU matmul for all pairs of row field i.
        a = jnp.dot(k_i, p_i, preferred_element_type=jnp.float32)   # (nj*D, TB) f32
        a = a.reshape(nj, D, a.shape[-1])                    # free leading-dim split
        q = x_ref[pl.ds(i + 1, nj), :, :].astype(jnp.float32)       # (nj, D, TB)
        out_i = jnp.sum(a * q, axis=1)                       # sublane reduce -> (nj, TB)
        o_ref[pl.ds(off, nj), :] = out_i.astype(o_ref.dtype)
        off += nj


def _opn_vec_kernel(x_ref, k_ref, o_ref, *, num_fields):
    """kernel_type in ('vec', 'num'): out[n, b] = sum_d p*q*k  (pure VPU, fp32)."""
    F = num_fields
    off = 0
    for i in range(F - 1):
        nj = F - 1 - i
        p_i = x_ref[i].astype(jnp.float32)                   # (D, TB)
        q = x_ref[pl.ds(i + 1, nj), :, :].astype(jnp.float32)        # (nj, D, TB)
        k_i = k_ref[pl.ds(off, nj), :].astype(jnp.float32)   # (nj, D) or (nj, 1)
        out_i = jnp.sum(p_i[None, :, :] * q * k_i[:, :, None], axis=1)  # (nj, TB)
        o_ref[pl.ds(off, nj), :] = out_i.astype(o_ref.dtype)
        off += nj


# ---------------------------------------------------------------------------
# Wrapper
# ---------------------------------------------------------------------------
def outer_product_network(x, kernel, kernel_type="mat", *,
                          max_batch_tile=512,
                          matmul_dtype=jnp.bfloat16,
                          vmem_limit_bytes=None):
    """x: (B, F, D); kernel: (D, num_ix, D) | (num_ix, D) | (num_ix, 1).

    Returns (B, num_ix), matching OuterProductNetwork.forward.

    NOTE(v7x): 64 MiB VMEM / 2 TensorCores per chip -> use max_batch_tile=256
    for large F*D; the tile chooser already prefers >=2 grid steps so the
    "parallel" batch axis shards across both cores.
    """
    B, F, D = x.shape
    assert F >= 2, "need at least two fields"
    num_ix = F * (F - 1) // 2

    # One HBM re-layout: (B, F, D) -> (F, D, B) puts the batch on the lane axis.
    # TODO(synk): if the embedding producer can emit (F, D, B) directly, skip this.
    x_t = jnp.transpose(x, (1, 2, 0))

    # Pad batch only to a lane multiple (128), never up to a tile multiple.
    b_pad = _round_up(B, 128)
    if b_pad != B:
        x_t = jnp.pad(x_t, ((0, 0), (0, 0), (0, b_pad - B)))

    # Batch tile: a 128-multiple divisor of b_pad, <= max_batch_tile, preferring
    # >=2 grid steps (megacore) when the batch allows it.
    m = b_pad // 128
    ks = [k for k in range(1, m + 1) if m % k == 0 and 128 * k <= max_batch_tile]
    ks_multi = [k for k in ks if m // k >= 2]
    tb = 128 * (max(ks_multi) if ks_multi else max(ks))
    grid = b_pad // tb

    if kernel_type == "mat":
        # (D, num_ix, D) -> (num_ix, D, D) -> (num_ix*D, D): the pair matrices of
        # row field i form one contiguous ((F-1-i)*D, D) block; bf16 for the MXU.
        k_arg = (jnp.transpose(kernel, (1, 0, 2))
                 .reshape(num_ix * D, D).astype(matmul_dtype))
        body = functools.partial(_opn_mat_kernel, num_fields=F, embed_dim=D,
                                 mm_dtype=matmul_dtype)
    elif kernel_type in ("vec", "num"):
        k_arg = kernel
        body = functools.partial(_opn_vec_kernel, num_fields=F)
    else:
        raise ValueError("unknown kernel type: " + kernel_type)

    # Rough per-step VMEM budget; raise the scoped window only when needed
    # (32 MiB default on v6e/v7x, 16 MiB on v5e).
    itm_x = jnp.dtype(x.dtype).itemsize
    itm_k = jnp.dtype(k_arg.dtype).itemsize
    est = (2 * (F * D * tb * itm_x                                  # x tile, dbl-buffered
                + _round_up(k_arg.shape[0], 8) * 128 * itm_k        # resident K (lane-padded)
                + _round_up(num_ix, 8) * tb * itm_x)                # out tile
           + 3 * (F - 1) * D * tb * 4)                              # fp32 intermediates
    if vmem_limit_bytes is None and est > 24 * 2**20:
        vmem_limit_bytes = min(int(1.5 * est), 100 * 2**20)

    cp_kwargs = dict(dimension_semantics=("parallel",))
    if vmem_limit_bytes is not None:
        cp_kwargs["vmem_limit_bytes"] = int(vmem_limit_bytes)

    grid_spec = pltpu.PrefetchScalarGridSpec(
        num_scalar_prefetch=0,
        grid=(grid,),
        in_specs=[
            pl.BlockSpec((F, D, tb), lambda b: (0, 0, b)),              # x tile
            pl.BlockSpec(k_arg.shape, lambda b: (0,) * k_arg.ndim),     # K resident
        ],
        out_specs=pl.BlockSpec((num_ix, tb), lambda b: (0, b)),
    )
    out_t = pl.pallas_call(
        body,
        out_shape=jax.ShapeDtypeStruct((num_ix, b_pad), x.dtype),
        grid_spec=grid_spec,
        compiler_params=pltpu.CompilerParams(**cp_kwargs),
    )(x_t, k_arg)

    return out_t[:, :B].T                                    # (B, num_ix)


# ---------------------------------------------------------------------------
# Deterministic parameter init (mirrors torch.nn.init.xavier_uniform_)
# ---------------------------------------------------------------------------
def xavier_uniform(key, shape):
    fan_out, fan_in = shape[0], shape[1] if len(shape) > 1 else shape[0]
    receptive = int(np.prod(shape[2:])) if len(shape) > 2 else 1
    bound = float(np.sqrt(6.0 / (fan_in * receptive + fan_out * receptive)))
    return jax.random.uniform(key, shape, jnp.float32, -bound, bound)


# ---------------------------------------------------------------------------
# Pure-JAX references (literal transcription of the torch forward)
# ---------------------------------------------------------------------------
def _pairs(F):
    row = [i for i in range(F - 1) for _ in range(i + 1, F)]
    col = [j for i in range(F - 1) for j in range(i + 1, F)]
    return row, col


def reference(x, kernel, kernel_type="mat"):
    """fp32 throughout (elementwise + sum only, so XLA computes it exactly)."""
    F = x.shape[1]
    row, col = _pairs(F)
    p, q = x[:, row, :], x[:, col, :]
    if kernel_type == "mat":
        kp = jnp.sum(p[:, None, :, :] * kernel[None, :, :, :], axis=-1)   # (B, D, num_ix)
        kp = jnp.transpose(kp, (0, 2, 1))                                 # (B, num_ix, D)
        return jnp.sum(kp * q, axis=-1)
    return jnp.sum(p * q * kernel[None], axis=-1)


def reference_mat_bf16_ops(x, kernel):
    """'mat' reference matching the kernel's default precision: bf16 MXU operands
    (x and K rounded to bf16 for the K@p contraction), fp32 accumulation, fp32 q."""
    F = x.shape[1]
    row, col = _pairs(F)
    p = x.astype(jnp.bfloat16).astype(jnp.float32)[:, row, :]
    q = x[:, col, :]
    kb = kernel.astype(jnp.bfloat16).astype(jnp.float32)
    kp = jnp.sum(p[:, None, :, :] * kb[None, :, :, :], axis=-1)
    kp = jnp.transpose(kp, (0, 2, 1))
    return jnp.sum(kp * q, axis=-1)


if __name__ == "__main__":
    B, F, D = 8, 5, 32                       # num_ix = 10
    num_ix = F * (F - 1) // 2

    key = jax.random.PRNGKey(0)
    kx, km, kv, kn, kb = jax.random.split(key, 5)
    x = jax.random.normal(kx, (B, F, D), dtype=jnp.float32)

    # kernel_type = 'mat' (module default): default bf16 MXU operands, fp32 accum.
    kernel_mat = xavier_uniform(km, (D, num_ix, D))
    out_mat = jax.block_until_ready(outer_product_network(x, kernel_mat, "mat"))
    np.testing.assert_allclose(np.asarray(out_mat),
                               np.asarray(reference_mat_bf16_ops(x, kernel_mat)),
                               rtol=1e-3, atol=1e-3)

    # Same path with fp32 MXU operands; loose tolerance covers possible reduced
    # precision in the backend's f32 matmul lowering.
    out_mat32 = jax.block_until_ready(
        outer_product_network(x, kernel_mat, "mat", matmul_dtype=jnp.float32))
    np.testing.assert_allclose(np.asarray(out_mat32),
                               np.asarray(reference(x, kernel_mat, "mat")),
                               rtol=5e-2, atol=5e-2)

    # kernel_type = 'vec' (pure VPU fp32, exact).
    kernel_vec = xavier_uniform(kv, (num_ix, D))
    out_vec = jax.block_until_ready(outer_product_network(x, kernel_vec, "vec"))
    np.testing.assert_allclose(np.asarray(out_vec),
                               np.asarray(reference(x, kernel_vec, "vec")),
                               rtol=1e-5, atol=1e-5)

    # kernel_type = 'num'.
    kernel_num = xavier_uniform(kn, (num_ix, 1))
    out_num = jax.block_until_ready(outer_product_network(x, kernel_num, "num"))
    np.testing.assert_allclose(np.asarray(out_num),
                               np.asarray(reference(x, kernel_num, "num")),
                               rtol=1e-5, atol=1e-5)

    # Multi-step grid + ragged batch (B not a multiple of 128): b_pad=640,
    # tb=128, grid=5 -> exercises padding slice-off and the parallel batch axis.
    Bt = 600
    xb = jax.random.normal(kb, (Bt, F, D), dtype=jnp.float32)
    out_big = jax.block_until_ready(outer_product_network(xb, kernel_mat, "mat"))
    np.testing.assert_allclose(np.asarray(out_big),
                               np.asarray(reference_mat_bf16_ops(xb, kernel_mat)),
                               rtol=1e-3, atol=1e-3)

    print("KERNEL_OK")
</pallas_src>

<mosaic_0001>
module attributes {stable_mosaic.version = 11 : i64} {
  func.func @_opn_mat_kernel(%arg0: i32, %arg1: memref<5x32x128xf32, #tpu.memory_space<vmem>>, %arg2: memref<320x32xbf16, #tpu.memory_space<vmem>>, %arg3: memref<10x128xf32, #tpu.memory_space<vmem>>) attributes {dimension_semantics = [#tpu.dimension_semantics<parallel>], iteration_bounds = array<i64: 1>, scalar_prefetch = 0 : i64, scratch_operands = 0 : i64, tpu.core_type = #tpu.core_type<tc>, window_params = [{transform_indices = @transform_0, window_bounds = array<i64: 5, 32, 128>}, {pipeline_mode = #tpu.pipeline_mode<synchronous>, transform_indices = @transform_1, window_bounds = array<i64: 320, 32>}, {transform_indices = @transform_2, window_bounds = array<i64: 10, 128>}]} {
    %c0 = arith.constant 0 : index
    %c0_0 = arith.constant 0 : index
    %c0_1 = arith.constant 0 : index
    %0 = vector.load %arg1[%c0, %c0_0, %c0_1] : memref<5x32x128xf32, #tpu.memory_space<vmem>>, vector<1x32x128xf32>
    %1 = vector.shape_cast %0 : vector<1x32x128xf32> to vector<32x128xf32>
    %2 = arith.truncf %1 : vector<32x128xf32> to vector<32x128xbf16>
    %c0_2 = arith.constant 0 : index
    %c0_3 = arith.constant 0 : index
    %3 = vector.load %arg2[%c0_2, %c0_3] : memref<320x32xbf16, #tpu.memory_space<vmem>>, vector<128x32xbf16>
    %cst = arith.constant dense<0.000000e+00> : vector<128x128xf32>
    %4 = tpu.matmul %3, %2, %cst {dimension_numbers = #tpu.dot_dimension_numbers<[1], [0], [0], [1], [0, 0, 1, 1], [], []>} : vector<128x32xbf16>, vector<32x128xbf16>, vector<128x128xf32> -> vector<128x128xf32>
    %5 = vector.shape_cast %4 : vector<128x128xf32> to vector<4x32x128xf32>
    %c1 = arith.constant 1 : index
    %c0_4 = arith.constant 0 : index
    %c0_5 = arith.constant 0 : index
    %6 = vector.load %arg1[%c1, %c0_4, %c0_5] : memref<5x32x128xf32, #tpu.memory_space<vmem>>, vector<4x32x128xf32>
    %7 = arith.mulf %5, %6 : vector<4x32x128xf32>
    %cst_6 = arith.constant dense<0.000000e+00> : vector<4x128xf32>
    %8 = vector.multi_reduction <add>, %7, %cst_6 [1] : vector<4x32x128xf32> to vector<4x128xf32>
    %c0_7 = arith.constant 0 : index
    %c0_8 = arith.constant 0 : index
    %9 = vector.load %arg3[%c0_7, %c0_8] : memref<10x128xf32, #tpu.memory_space<vmem>>, vector<4x128xf32>
    tpu.vector_store %arg3[%c0_7, %c0_8], %8 {strides = array<i32>} : memref<10x128xf32, #tpu.memory_space<vmem>>, vector<4x128xf32>,
    %c1_9 = arith.constant 1 : index
    %c0_10 = arith.constant 0 : index
    %c0_11 = arith.constant 0 : index
    %10 = vector.load %arg1[%c1_9, %c0_10, %c0_11] : memref<5x32x128xf32, #tpu.memory_space<vmem>>, vector<1x32x128xf32>
    %11 = vector.shape_cast %10 : vector<1x32x128xf32> to vector<32x128xf32>
    %12 = arith.truncf %11 : vector<32x128xf32> to vector<32x128xbf16>
    %c128 = arith.constant 128 : index
    %c0_12 = arith.constant 0 : index
    %13 = vector.load %arg2[%c128, %c0_12] : memref<320x32xbf16, #tpu.memory_space<vmem>>, vector<96x32xbf16>
    %cst_13 = arith.constant dense<0.000000e+00> : vector<96x128xf32>
    %14 = tpu.matmul %13, %12, %cst_13 {dimension_numbers = #tpu.dot_dimension_numbers<[1], [0], [0], [1], [0, 0, 1, 1], [], []>} : vector<96x32xbf16>, vector<32x128xbf16>, vector<96x128xf32> -> vector<96x128xf32>
    %15 = vector.shape_cast %14 : vector<96x128xf32> to vector<3x32x128xf32>
    %c2 = arith.constant 2 : index
    %c0_14 = arith.constant 0 : index
    %c0_15 = arith.constant 0 : index
    %16 = vector.load %arg1[%c2, %c0_14, %c0_15] : memref<5x32x128xf32, #tpu.memory_space<vmem>>, vector<3x32x128xf32>
    %17 = arith.mulf %15, %16 : vector<3x32x128xf32>
    %cst_16 = arith.constant dense<0.000000e+00> : vector<3x128xf32>
    %18 = vector.multi_reduction <add>, %17, %cst_16 [1] : vector<3x32x128xf32> to vector<3x128xf32>
    %c4 = arith.constant 4 : index
    %c0_17 = arith.constant 0 : index
    %19 = vector.load %arg3[%c4, %c0_17] : memref<10x128xf32, #tpu.memory_space<vmem>>, vector<3x128xf32>
    tpu.vector_store %arg3[%c4, %c0_17], %18 {strides = array<i32>} : memref<10x128xf32, #tpu.memory_space<vmem>>, vector<3x128xf32>,
    %c2_18 = arith.constant 2 : index
    %c0_19 = arith.constant 0 : index
    %c0_20 = arith.constant 0 : index
    %20 = vector.load %arg1[%c2_18, %c0_19, %c0_20] : memref<5x32x128xf32, #tpu.memory_space<vmem>>, vector<1x32x128xf32>
    %21 = vector.shape_cast %20 : vector<1x32x128xf32> to vector<32x128xf32>
    %22 = arith.truncf %21 : vector<32x128xf32> to vector<32x128xbf16>
    %c224 = arith.constant 224 : index
    %c0_21 = arith.constant 0 : index
    %23 = vector.load %arg2[%c224, %c0_21] : memref<320x32xbf16, #tpu.memory_space<vmem>>, vector<64x32xbf16>
    %cst_22 = arith.constant dense<0.000000e+00> : vector<64x128xf32>
    %24 = tpu.matmul %23, %22, %cst_22 {dimension_numbers = #tpu.dot_dimension_numbers<[1], [0], [0], [1], [0, 0, 1, 1], [], []>} : vector<64x32xbf16>, vector<32x128xbf16>, vector<64x128xf32> -> vector<64x128xf32>
    %25 = vector.shape_cast %24 : vector<64x128xf32> to vector<2x32x128xf32>
    %c3 = arith.constant 3 : index
    %c0_23 = arith.constant 0 : index
    %c0_24 = arith.constant 0 : index
    %26 = vector.load %arg1[%c3, %c0_23, %c0_24] : memref<5x32x128xf32, #tpu.memory_space<vmem>>, vector<2x32x128xf32>
    %27 = arith.mulf %25, %26 : vector<2x32x128xf32>
    %cst_25 = arith.constant dense<0.000000e+00> : vector<2x128xf32>
    %28 = vector.multi_reduction <add>, %27, %cst_25 [1] : vector<2x32x128xf32> to vector<2x128xf32>
    %c7 = arith.constant 7 : index
    %c0_26 = arith.constant 0 : index
    %29 = vector.load %arg3[%c7, %c0_26] : memref<10x128xf32, #tpu.memory_space<vmem>>, vector<2x128xf32>
    tpu.vector_store %arg3[%c7, %c0_26], %28 {strides = array<i32>} : memref<10x128xf32, #tpu.memory_space<vmem>>, vector<2x128xf32>,
    %c3_27 = arith.constant 3 : index
    %c0_28 = arith.constant 0 : index
    %c0_29 = arith.constant 0 : index
    %30 = vector.load %arg1[%c3_27, %c0_28, %c0_29] : memref<5x32x128xf32, #tpu.memory_space<vmem>>, vector<1x32x128xf32>
    %31 = vector.shape_cast %30 : vector<1x32x128xf32> to vector<32x128xf32>
    %32 = arith.truncf %31 : vector<32x128xf32> to vector<32x128xbf16>
    %c288 = arith.constant 288 : index
    %c0_30 = arith.constant 0 : index
    %33 = vector.load %arg2[%c288, %c0_30] : memref<320x32xbf16, #tpu.memory_space<vmem>>, vector<32x32xbf16>
    %cst_31 = arith.constant dense<0.000000e+00> : vector<32x128xf32>
    %34 = tpu.matmul %33, %32, %cst_31 {dimension_numbers = #tpu.dot_dimension_numbers<[1], [0], [0], [1], [0, 0, 1, 1], [], []>} : vector<32x32xbf16>, vector<32x128xbf16>, vector<32x128xf32> -> vector<32x128xf32>
    %35 = vector.shape_cast %34 : vector<32x128xf32> to vector<1x32x128xf32>
    %c4_32 = arith.constant 4 : index
    %c0_33 = arith.constant 0 : index
    %c0_34 = arith.constant 0 : index
    %36 = vector.load %arg1[%c4_32, %c0_33, %c0_34] : memref<5x32x128xf32, #tpu.memory_space<vmem>>, vector<1x32x128xf32>
    %37 = arith.mulf %35, %36 : vector<1x32x128xf32>
    %cst_35 = arith.constant dense<0.000000e+00> : vector<1x128xf32>
    %38 = vector.multi_reduction <add>, %37, %cst_35 [1] : vector<1x32x128xf32> to vector<1x128xf32>
    %c9 = arith.constant 9 : index
    %c0_36 = arith.constant 0 : index
    %39 = vector.load %arg3[%c9, %c0_36] : memref<10x128xf32, #tpu.memory_space<vmem>>, vector<1x128xf32>
    tpu.vector_store %arg3[%c9, %c0_36], %38 {strides = array<i32>} : memref<10x128xf32, #tpu.memory_space<vmem>>, vector<1x128xf32>,
    return
  }
  func.func @transform_0(%arg0: i32) -> (i32, i32, i32) {
    %c0_i32 = arith.constant 0 : i32
    %c0_i32_0 = arith.constant 0 : i32
    %c0_i32_1 = arith.constant 0 : i32
    return %c0_i32, %c0_i32_0, %arg0 : i32, i32, i32
  }
  func.func @transform_1(%arg0: i32) -> (i32, i32) {
    %c0_i32 = arith.constant 0 : i32
    %c0_i32_0 = arith.constant 0 : i32
    %c0_i32_1 = arith.constant 0 : i32
    return %c0_i32, %c0_i32_0 : i32, i32
  }
  func.func @transform_2(%arg0: i32) -> (i32, i32) {
    %c0_i32 = arith.constant 0 : i32
    %c0_i32_0 = arith.constant 0 : i32
    return %c0_i32, %arg0 : i32, i32
  }
}

</mosaic_0001>

<bundles_post_ra>
// kernel: tpu_custom_call.1
= control target key start
LH: loop header
LB: loop body
LE: loop exit
PB: predicated region body
PF: predicated region fallthrough
CT: control target
= control target key end

     0   :  { %vm75_vm0 = vcmask 261120   ;;  %s1220_s0 = inlined_call_operand.vmem [shape: f32[5,32,128], index: 0, kind: input, shape index: {}]   ;;  %s1221_s1 = inlined_call_operand.vmem [shape: bf16[320,32], index: 1, kind: input, shape index: {}]   ;;  %s1222_s2 = inlined_call_operand.hbm [shape: f32[10,128], index: 2, kind: output, shape index: {}]  }
   0x1   :  { %v15_v0 = vld [vmem:[%s1220_s0 + $0x10] sm:$0xff]  ;;  %v16_v1 = vld [vmem:[%s1220_s0 + $0x18] sm:$0xff]  ;;  %v13_v5 = vld [vmem:[%s1220_s0] sm:$0xff] }
   0x2   :  { %v993_v2 = vld [vmem:[%s1220_s0 + $0x30] sm:$0xff]  ;;  %v18_v3 = vpack.c.bf16 %v16_v1, %v15_v0  ;;  %v998_v4 = vld [vmem:[%s1220_s0 + $0x38] sm:$0xff]  ;;  %v14_v6 = vld [vmem:[%s1220_s0 + $0x8] sm:$0xff] }
   0x3   :  { %v283_v7 = vpack.c.bf16 %v998_v4, %v993_v2  ;;  %v17_v8 = vpack.c.bf16 %v14_v6, %v13_v5  ;;  %v1011_v9 = vld [vmem:[%s1220_s0 + $0x20] sm:$0xff]  ;;  %v1016_v10 = vld [vmem:[%s1220_s0 + $0x28] sm:$0xff]  ;;  %v1033_v15 = vld [vmem:[%s1220_s0 + $0x50] sm:$0xff] }
   0x4   :  { %865 = vmatprep.subr.bf16.mxu0 %v18_v3  ;;  %v282_v11 = vpack.c.bf16 %v1016_v10, %v1011_v9  ;;  %v924_v12 = vld [vmem:[%s1221_s1] sm:$0xff]   ;;  %v926_v14 = vld [vmem:[%s1221_s1 + $0x8] sm:$0xff]   ;;  %v1039_v16 = vld [vmem:[%s1220_s0 + $0x58] sm:$0xff] }
   0x5   :  { %885 = vmatprep.subr.bf16.mxu1 %v283_v7  ;;  %866 = vmatpush3.bf16.msra.mxu0 %v18_v3  ;;  %v925_v13 = vld [vmem:[%s1221_s1 + $0x40] sm:$0xff]   ;;  %v1044_v17 = vld [vmem:[%s1220_s0 + $0x70] sm:$0xff]  ;;  %v1049_v18 = vld [vmem:[%s1220_s0 + $0x78] sm:$0xff]  ;;  %v489_v20 = vpack.c.bf16 %v1039_v16, %v1033_v15 }
   0x6   :  { %886 = vmatpush3.bf16.msra.mxu1 %v283_v7  ;;  %867 = vmatprep.subr.bf16.mxu0 %v17_v8  ;;  %v927_v19 = vld [vmem:[%s1221_s1 + $0x48] sm:$0xff]   ;;  %v640_v21 = vpack.c.bf16 %v1049_v18, %v1044_v17  ;;  %v928_v22 = vld [vmem:[%s1221_s1 + $0x10] sm:$0xff]   ;;  %v1069_v24 = vld [vmem:[%s1220_s0 + $0x40] sm:$0xff] }
   0x7   :  { %887 = vmatprep.subr.bf16.mxu1 %v282_v11  ;;  %869 = vmatprep.mubr.msk.bf16.mxu0 %vm75_vm0, %v924_v12  ;;  %v929_v23 = vld [vmem:[%s1221_s1 + $0x50] sm:$0xff]   ;;  %v1074_v25 = vld [vmem:[%s1220_s0 + $0x48] sm:$0xff]  ;;  %v930_v26 = vld [vmem:[%s1221_s1 + $0x18] sm:$0xff]  }
   0x8   :  { %889 = vmatprep.mubr.msk.bf16.mxu1 %vm75_vm0, %v925_v13  ;;  %v488_v27 = vpack.c.bf16 %v1074_v25, %v1069_v24  ;;  %v931_v28 = vld [vmem:[%s1221_s1 + $0x58] sm:$0xff]   ;;  %v932_v29 = vld [vmem:[%s1221_s1 + $0x20] sm:$0xff]   ;;  %v1100_v32 = vld [vmem:[%s1220_s0 + $0x68] sm:$0xff] }
   0x9   :  { %868 = vmatpush3.bf16.msra.mxu0 %v17_v8  ;;  %v933_v30 = vld [vmem:[%s1221_s1 + $0x60] sm:$0xff]   ;;  %v934_v34 = vld [vmem:[%s1221_s1 + $0x28] sm:$0xff]   ;;  %v936_v36 = vld [vmem:[%s1221_s1 + $0x30] sm:$0xff]  }
   0xa   :  { %888 = vmatpush3.bf16.msra.mxu1 %v282_v11  ;;  %913 = vmatprep.subr.bf16.mxu0 %v640_v21  ;;  %v1095_v31 = vld [vmem:[%s1220_s0 + $0x60] sm:$0xff]  ;;  %v935_v35 = vld [vmem:[%s1221_s1 + $0x68] sm:$0xff]   ;;  %v937_v37 = vld [vmem:[%s1221_s1 + $0x70] sm:$0xff]  }
   0xb   :  { %901 = vmatprep.subr.bf16.mxu1 %v489_v20  ;;  %v639_v33 = vpack.c.bf16 %v1100_v32, %v1095_v31 }
   0xc   :  { %870 = vmatmul.mubr.msk.bf16.vlgmr.msra.gmra.mxu0 %vm75_vm0, %v926_v14 }
   0xd   :  { %890 = vmatmul.mubr.msk.bf16.vlgmr.msra.gmra.mxu1 %vm75_vm0, %v927_v19  ;;  %914 = vmatpush3.bf16.msra.mxu0 %v640_v21 }
   0xe   :  { %902 = vmatpush3.bf16.msra.mxu1 %v489_v20  ;;  %873 = vmatprep.mubr.msk.bf16.mxu0 %vm75_vm0, %v928_v22 }
   0xf   :  { %893 = vmatprep.mubr.msk.bf16.mxu1 %vm75_vm0, %v929_v23  ;;  %903 = vmatprep.subr.bf16.mxu1 %v488_v27 }
  0x10   :  { %915 = vmatprep.subr.bf16.mxu0 %v639_v33 }
  0x11   :  { %916 = vmatpush3.bf16.msra.mxu0 %v639_v33 }
  0x12   :  { %904 = vmatpush3.bf16.msra.mxu1 %v488_v27 }
  0x14   :  { %874 = vmatmul.mubr.msk.bf16.gmra.mxu0 %vm75_vm0, %v930_v26 }
  0x15   :  { %894 = vmatmul.mubr.msk.bf16.gmra.mxu1 %vm75_vm0, %v931_v28  ;;  %877 = vmatprep.mubr.msk.bf16.mxu0 %vm75_vm0, %v932_v29 }
  0x16   :  { %897 = vmatprep.mubr.msk.bf16.mxu1 %vm75_vm0, %v933_v30 }
  0x17   :  { %7 = vsyncpa [#allocation3], 0  ;;  %v938_v38 = vld [vmem:[%s1221_s1 + $0x38] sm:$0xff]   ;;  %v941_v40 = vld [vmem:[%s1221_s1 + $0x90] sm:$0xff]   ;;  %vm270_vm1 = vcmask 1041409   ;;  %vm272_vm2 = vcmask 1042434  }
  0x18   :  { %v939_v39 = vld [vmem:[%s1221_s1 + $0x78] sm:$0xff]   ;;  %v940_v41 = vld [vmem:[%s1221_s1 + $0x80] sm:$0xff]   ;;  %v942_v43 = vld [vmem:[%s1221_s1 + $0x88] sm:$0xff]   ;;  %vm274_vm3 = vcmask 1043459  }
  0x19   :  { %v943_v42 = vld [vmem:[%s1221_s1 + $0x98] sm:$0xff]  }
  0x1c   :  { %878 = vmatmul.mubr.msk.bf16.gmra.mxu0 %vm75_vm0, %v934_v34 }
  0x1d   :  { %898 = vmatmul.mubr.msk.bf16.gmra.mxu1 %vm75_vm0, %v935_v35  ;;  %881 = vmatprep.mubr.msk.bf16.mxu0 %vm75_vm0, %v936_v36 }
  0x1e   :  { %905 = vmatprep.mubr.msk.bf16.mxu1 %vm75_vm0, %v937_v37 }
  0x24   :  { %882 = vmatmul.mubr.msk.bf16.gmra.mxu0 %vm75_vm0, %v938_v38  ;;  %v1172_v38 = vld [vmem:[%s1220_s0 + $0x88] sm:$0xff] }
  0x25   :  { %906 = vmatmul.mubr.msk.bf16.vlgmr.msra.gmra.mxu1 %vm75_vm0, %v939_v39  ;;  %917 = vmatprep.mubr.msk.bf16.mxu0 %vm75_vm0, %v941_v40 }
  0x26   :  { %909 = vmatprep.mubr.msk.bf16.mxu1 %vm75_vm0, %v940_v41  ;;  %v1177_v41 = vld [vmem:[%s1220_s0 + $0x90] sm:$0xff] }
  0x2c   :  { %918 = vmatmul.mubr.msk.bf16.vlgmr.msra.gmra.mxu0 %vm75_vm0, %v943_v42 }
  0x2d   :  { %910 = vmatmul.mubr.msk.bf16.gmra.mxu1 %vm75_vm0, %v942_v43 }
  0xcc   :  { %v871_v44 = vpop.f32.mrf.mxu0 }
  0xcd   :  { %v891_v45 = vpop.f32.mrf.mxu1  ;;  %v216_v59 = vmul.f32 %v871_v44, %v993_v2 }
  0xce   :  { %v134_v46 = vpop.f32.mrf.mxu0  ;;  %v440_v60 = vmul.f32 %v891_v45, %v1033_v15 }
  0xcf   :  { %v378_v47 = vpop.f32.mrf.mxu1  ;;  %v214_v51 = vmul.f32 %v1011_v9, %v134_v46 }
  0xd0   :  { %v872_v48 = vpop.f32.mrf.mxu0  ;;  %v438_v54 = vmul.f32 %v1069_v24, %v378_v47 }
  0xd1   :  { %v892_v49 = vpop.f32.mrf.mxu1  ;;  %v217_v7 = vmul.f32 %v872_v48, %v998_v4 }
  0xd2   :  { %v137_v50 = vpop.f32.mrf.mxu0  ;;  %v441_v0 = vmul.f32 %v892_v49, %v1039_v16 }
  0xd3   :  { %v215_v52 = vmul.f32 %v1016_v10, %v137_v50  ;;  %v381_v53 = vpop.f32.mrf.mxu1 }
  0xd4   :  { %v439_v55 = vmul.f32 %v1074_v25, %v381_v53  ;;  %v875_v56 = vpop.f32.mrf.mxu0 }
  0xd5   :  { %v230_v57 = vadd.f32 %v215_v52, %v214_v51  ;;  %v895_v58 = vpop.f32.mrf.mxu1  ;;  %v220_v21 = vmul.f32 %v875_v56, %v1033_v15  ;;  %v1167_v15 = vld [vmem:[%s1220_s0 + $0x80] sm:$0xff]  ;;  %v1187_v52 = vld [vmem:[%s1220_s0 + $0x98] sm:$0xff]  ;;  %s966_s0 = smov [#allocation2]  }
  0xd6   :  { %v450_v61 = vadd.f32 %v439_v55, %v438_v54  ;;  %v150_v62 = vpop.f32.mrf.mxu0  ;;  %v444_v4 = vmul.f32 %v895_v58, %v1044_v17  ;;  %s734_s4 = sshll.u32 %s966_s0, 4  ;;  %s735_s4 = int_to_ptr.vmem [resolvable:$true] %s734_s4 }
  0xd7   :  { %v394_v63 = vpop.f32.mrf.mxu1  ;;  %v231_v1 = vadd.f32 %v230_v57, %v216_v59  ;;  %v218_v10 = vmul.f32 %v1069_v24, %v150_v62  ;;  %s944_s5 = scalar_lea.vmem %s735_s4, 256  ;;  %p949_p1 = scmp.lt.s32.totalorder %s735_s4, %s735_s4 }
  0xd8   :  { %v451_v3 = vadd.f32 %v450_v61, %v440_v60  ;;  %v876_v5 = vpop.f32.mrf.mxu0  ;;  %v442_v13 = vmul.f32 %v1095_v31, %v394_v63  ;;  %p945_p0 = scmp.ne.s32.totalorder %s735_s4, %s944_s5  ;;  %p950_p2 = scmp.lt.s32.totalorder %s944_s5, %s944_s5 }
  0xd9   :  { %v896_v6 = vpop.f32.mrf.mxu1  ;;  %v232_v12 = vadd.f32 %v231_v1, %v217_v7  ;;  %v221_v24 = vmul.f32 %v876_v5, %v1039_v16 }
  0xda   :  { %v452_v8 = vadd.f32 %v451_v3, %v441_v0  ;;  %v153_v9 = vpop.f32.mrf.mxu0  ;;  %v445_v30 = vmul.f32 %v896_v6, %v1049_v18  ;;  %p951_p3 = por %p950_p2, %p949_p1 }
  0xdb   :  { %v219_v11 = vmul.f32 %v1074_v25, %v153_v9  ;;  %v397_v2 = vpop.f32.mrf.mxu1  ;;  %v233_v29 = vrot.slane %v232_v12, 4 }
  0xdc   :  { %v443_v14 = vmul.f32 %v1100_v32, %v397_v2  ;;  %v879_v19 = vpop.f32.mrf.mxu0  ;;  %v453_v20 = vrot.slane %v452_v8, 4  ;;  %p952_p4 = pnand %p951_p3, %p945_p0 }
  0xdd   :  { %v239_v22 = vadd.f32 %v219_v11, %v218_v10  ;;  %v899_v23 = vpop.f32.mrf.mxu1  ;;  %v234_v45 = vadd.f32 %v233_v29, %v232_v12  ;;  %v224_v51 = vmul.f32 %v879_v19, %v1044_v17 }
  0xde   :  { %v459_v26 = vadd.f32 %v443_v14, %v442_v13  ;;  %v166_v27 = vpop.f32.mrf.mxu0  ;;  %v454_v35 = vadd.f32 %v453_v20, %v452_v8  ;;  %v448_v57 = vmul.f32 %v899_v23, %v1177_v41 }
  0xdf   :  { %v240_v28 = vadd.f32 %v239_v22, %v220_v21  ;;  %v410_v25 = vpop.f32.mrf.mxu1  ;;  %v222_v42 = vmul.f32 %v1095_v31, %v166_v27  ;;  %v235_v63 = vrot.slane %v234_v45, 2 }
  0xe0   :  { %v460_v33 = vadd.f32 %v459_v26, %v444_v4  ;;  %v880_v34 = vpop.f32.mrf.mxu0  ;;  %v446_v47 = vmul.f32 %v1167_v15, %v410_v25  ;;  %v455_v50 = vrot.slane %v454_v35, 2 }
  0xe1   :  { %v241_v36 = vadd.f32 %v240_v28, %v221_v24  ;;  %v900_v37 = vpop.f32.mrf.mxu1  ;;  %v225_v60 = vmul.f32 %v880_v34, %v1049_v18  ;;  %v1194_v20 = vadd.f32 %v235_v63, %v234_v45 }
  0xe2   :  { %v461_v16 = vadd.f32 %v460_v33, %v445_v30  ;;  %v169_v39 = vpop.f32.mrf.mxu0  ;;  %v449_v1 = vmul.f32 %v900_v37, %v1187_v52  ;;  %v456_v6 = vadd.f32 %v455_v50, %v454_v35 }
  0xe3   :  { %v242_v40 = vrot.slane %v241_v36, 4  ;;  %v223_v43 = vmul.f32 %v1100_v32, %v169_v39  ;;  %v413_v44 = vpop.f32.mrf.mxu1 }
  0xe4   :  { %v462_v46 = vrot.slane %v461_v16, 4  ;;  %v447_v48 = vmul.f32 %v1172_v38, %v413_v44  ;;  %v883_v49 = vpop.f32.mrf.mxu0  ;;  %v457_v26 = vrot.slane %v456_v6, 1  ;;  %v237_v44 = vrot.slane %v1194_v20, 1 }
  0xe5   :  { %v248_v53 = vadd.f32 %v223_v43, %v222_v42  ;;  %v907_v54 = vpop.f32.mrf.mxu1  ;;  %v243_v55 = vadd.f32 %v242_v40, %v241_v36  ;;  %v228_v24 = vmul.f32 %v883_v49, %v1177_v41 }
  0xe6   :  { %v463_v56 = vadd.f32 %v462_v46, %v461_v16  ;;  %v468_v58 = vadd.f32 %v447_v48, %v446_v47  ;;  %v182_v59 = vpop.f32.mrf.mxu0  ;;  %v606_v33 = vmul.f32 %v907_v54, %v1044_v17  ;;  %v458_v45 = vadd.f32 %v457_v26, %v456_v6 }
  0xe7   :  { %v249_v61 = vadd.f32 %v248_v53, %v224_v51  ;;  %v564_v62 = vpop.f32.mrf.mxu1  ;;  %v244_v9 = vrot.slane %v243_v55, 2  ;;  %v226_v13 = vmul.f32 %v1167_v15, %v182_v59 }
  0xe8   :  { %v464_v0 = vrot.slane %v463_v56, 2  ;;  %v469_v3 = vadd.f32 %v468_v58, %v448_v57  ;;  %v884_v5 = vpop.f32.mrf.mxu0  ;;  %v604_v22 = vmul.f32 %v1095_v31, %v564_v62 }
  0xe9   :  { %v250_v7 = vadd.f32 %v249_v61, %v225_v60  ;;  %v908_v8 = vpop.f32.mrf.mxu1  ;;  %v245_v29 = vadd.f32 %v244_v9, %v243_v55  ;;  %v229_v16 = vmul.f32 %v884_v5, %v1187_v52 }
  0xea   :  { %v470_v10 = vadd.f32 %v469_v3, %v449_v1  ;;  %v185_v11 = vpop.f32.mrf.mxu0  ;;  %v465_v2 = vadd.f32 %v464_v0, %v463_v56  ;;  %v607_v40 = vmul.f32 %v908_v8, %v1049_v18 }
  0xeb   :  { %v251_v12 = vrot.slane %v250_v7, 4  ;;  %v227_v14 = vmul.f32 %v1172_v38, %v185_v11  ;;  %v567_v19 = vpop.f32.mrf.mxu1  ;;  %v246_v47 = vrot.slane %v245_v29, 1 }
  0xec   :  { %v471_v21 = vrot.slane %v470_v10, 4  ;;  %v605_v23 = vmul.f32 %v1100_v32, %v567_v19  ;;  %v919_v4 = vpop.f32.mrf.mxu0  ;;  %v466_v36 = vrot.slane %v465_v2, 1 }
  0xed   :  { %v252_v27 = vadd.f32 %v251_v12, %v250_v7  ;;  %v257_v28 = vadd.f32 %v227_v14, %v226_v13  ;;  %v911_v25 = vpop.f32.mrf.mxu1  ;;  %v717_v63 = vmul.f32 %v919_v4, %v1177_v41 }
  0xee   :  { %v472_v30 = vadd.f32 %v471_v21, %v470_v10  ;;  %v612_v34 = vadd.f32 %v605_v23, %v604_v22  ;;  %v695_v35 = vpop.f32.mrf.mxu0  ;;  %v467_v53 = vadd.f32 %v466_v36, %v465_v2  ;;  %v610_v62 = vmul.f32 %v911_v25, %v1177_v41 }
  0xef   :  { %v253_v37 = vrot.slane %v252_v27, 2  ;;  %v258_v31 = vadd.f32 %v257_v28, %v228_v24  ;;  %v580_v39 = vpop.f32.mrf.mxu1  ;;  %v715_v55 = vmul.f32 %v1167_v15, %v695_v35  ;;  %v247_v2 = vadd.f32 %v246_v47, %v245_v29 }
  0xf0   :  { %v473_v32 = vrot.slane %v472_v30, 2  ;;  %v613_v42 = vadd.f32 %v612_v34, %v606_v33  ;;  %v920_v43 = vpop.f32.mrf.mxu0  ;;  %v608_v59 = vmul.f32 %v1167_v15, %v580_v39  ;;  %v480_v7 = vsel %vm270_vm1, %v467_v53, %v458_v45 }
  0xf1   :  { %v259_v46 = vadd.f32 %v258_v31, %v229_v16  ;;  %v912_v17 = vpop.f32.mrf.mxu1  ;;  %v254_v48 = vadd.f32 %v253_v37, %v252_v27  ;;  %v718_v9 = vmul.f32 %v920_v43, %v1187_v52  ;;  %v238_v21 = vadd.f32 %v237_v44, %v1194_v20 }
  0xf2   :  { %v474_v49 = vadd.f32 %v473_v32, %v472_v30  ;;  %v614_v50 = vadd.f32 %v613_v42, %v607_v40  ;;  %v698_v51 = vpop.f32.mrf.mxu0  ;;  %v611_v15 = vmul.f32 %v912_v17, %v1187_v52 }
  0xf3   :  { %v260_v54 = vrot.slane %v259_v46, 4  ;;  %v583_v56 = vpop.f32.mrf.mxu1  ;;  %v716_v18 = vmul.f32 %v1172_v38, %v698_v51  ;;  %v255_v1 = vrot.slane %v254_v48, 1  ;;  %v271_v26 = vsel %vm270_vm1, %v247_v2, %v238_v21 }
  0xf4   :  { %v475_v57 = vrot.slane %v474_v49, 1  ;;  %v615_v58 = vrot.slane %v614_v50, 4  ;;  %v609_v60 = vmul.f32 %v1172_v38, %v583_v56 }
  0xf5   :  { %v261_v61 = vadd.f32 %v260_v54, %v259_v46  ;;  %v719_v0 = vadd.f32 %v716_v18, %v715_v55  ;;  %v256_v41 = vadd.f32 %v255_v1, %v254_v48 }
  0xf6   :  { %v476_v3 = vadd.f32 %v475_v57, %v474_v49  ;;  %v616_v5 = vadd.f32 %v615_v58, %v614_v50  ;;  %v621_v6 = vadd.f32 %v609_v60, %v608_v59 }
  0xf7   :  { %v262_v8 = vrot.slane %v261_v61, 2  ;;  %v720_v10 = vadd.f32 %v719_v0, %v717_v63  ;;  %v273_v24 = vsel %vm272_vm2, %v256_v41, %v271_v26 }
  0xf8   :  { %v622_v11 = vadd.f32 %v621_v6, %v610_v62  ;;  %v481_v38 = vsel %vm272_vm2, %v476_v3, %v480_v7  ;;  %v617_v14 = vrot.slane %v616_v5, 2 }
  0xf9   :  { %v263_v12 = vadd.f32 %v262_v8, %v261_v61  ;;  %v721_v13 = vadd.f32 %v720_v10, %v718_v9  ;;  %483 = vst [vmem:[#allocation2 + $0x4] sm:$0x7] %v481_v38 }
  0xfa   :  { %v623_v19 = vadd.f32 %v622_v11, %v611_v15  ;;  %v618_v28 = vadd.f32 %v617_v14, %v616_v5 }
  0xfb   :  { %v264_v22 = vrot.slane %v263_v12, 1  ;;  %v722_v23 = vrot.slane %v721_v13, 4 }
  0xfc   :  { %v624_v4 = vrot.slane %v623_v19, 4  ;;  %v619_v35 = vrot.slane %v618_v28, 1 }
  0xfd   :  { %v265_v27 = vadd.f32 %v264_v22, %v263_v12  ;;  %v723_v52 = vadd.f32 %v722_v23, %v721_v13 }
  0xfe   :  { %v625_v25 = vadd.f32 %v624_v4, %v623_v19  ;;  %v620_v31 = vadd.f32 %v619_v35, %v618_v28 }
  0xff   :  { %v724_v29 = vrot.slane %v723_v52, 2  ;;  %v275_v30 = vsel %vm274_vm3, %v265_v27, %v273_v24 }
 0x100   :  { %v626_v33 = vrot.slane %v625_v25, 2  ;;  %277 = vst [vmem:[#allocation2] sm:$0xf] %v275_v30 }
 0x101   :  { %v725_v34 = vadd.f32 %v724_v29, %v723_v52 }
 0x102   :  { %v627_v36 = vadd.f32 %v626_v33, %v625_v25 }
 0x103   :  { %v726_v20 = vrot.slane %v725_v34, 1 }
 0x104   :  { %v628_v37 = vrot.slane %v627_v36, 1 }
 0x105   :  { %v727_v16 = vadd.f32 %v726_v20, %v725_v34 }
 0x106   :  { %v629_v39 = vadd.f32 %v628_v37, %v627_v36 }
 0x107   :  { %728 = vst [vmem:[#allocation2 + $0x9] sm:$0x1] %v727_v16 }
 0x108   :  { %v632_v32 = vsel %vm270_vm1, %v629_v39, %v620_v31 }
 0x109   :  { %634 = vst [vmem:[#allocation2 + $0x7] sm:$0x3] %v632_v32 }
 0x10a   :  { %955 = shalt.err (!%p952_p4)
}
 0x10b   :  { %s967_s6 = smov 128   ;;  %s968_s7 = smov 8  }
 0x10c   :  { %740 = dma.vmem_to_hbm [thread:$0]  %s735_s4, 256, %s1222_s2, [#allocation3], %s967_s6, %s967_s6, %s968_s7  }
 0x10d   :  { %964 = dma.done.wait [#allocation3], 256  }
 0x10e   :  { %965 = vsyncadd [#allocation3], 4294967040 }
 0x10f   :  { %744 = vsyncpa [#allocation3], 1 }

</bundles_post_ra>
